<compile_context>
chip_gen: v7x
topology: tpu7x:2x2x1
jax: 0.10.0
libtpu: 0.0.40
codegen_flags: <defaults>
</compile_context>

<pallas_src>
import math

import jax
import jax.numpy as jnp
from jax.experimental import pallas as pl
from jax.experimental.pallas import tpu as pltpu

BN_EPS = 1e-5
LEAKY_SLOPE = 0.01      # nn.LeakyReLU() default negative_slope
TINY = 1e-30            # rsqrt clamp for |z|^2


def _bn_train(z):
    """BatchNorm1d, training mode, fresh module (gamma=1, beta=0, biased batch variance).
    Single fused axis-0 reduction over [z | z*z]; var = E[z^2] - mean^2."""
    n = z.shape[-1]
    stats = jnp.mean(jnp.concatenate([z, z * z], axis=-1), axis=0, keepdims=True)
    mean = stats[:, :n]
    var = jnp.maximum(stats[:, n:] - mean * mean, 0.0)
    return (z - mean) * jax.lax.rsqrt(var + BN_EPS)


def _make_kernel(num_hidden, matmul_dtype):
    """Kernel for num_hidden = len(hidden_dims) - 1 grouped-conv hidden layers (>= 1)."""

    def _dot(a, w_ref):
        # Cast only the matmul operand (weights already packed in matmul_dtype);
        # f32 accumulation; elementwise math stays f32.
        return jnp.dot(a.astype(matmul_dtype), w_ref[...],
                       preferred_element_type=jnp.float32)

    def kernel(x_ref, w_in_ref, b_mod_ref, w_h0_ref, *rest):
        rest_hidden = rest[:num_hidden - 1]                 # block-diag weights, layers 1..
        w_out_ref, b_out_ref, o_ref = rest[num_hidden - 1:]

        x = x_ref[...]                                      # (B, 2*in_dim), f32

        # ---- input complex linear layer: ONE fused matmul + ONE fused BN ----
        # columns [0:H) -> real part, [H:2H) -> imag part (biases dropped: cancelled by BN).
        z = _dot(x, w_in_ref)                               # (B, 2H)
        z = _bn_train(z)                                    # per-column => identical to 2 BNs
        H = z.shape[-1] // 2
        zr, zi = z[:, :H], z[:, H:]

        # ---- mod_relu with a single rsqrt (no sqrt, no divide) ----
        s2 = zr * zr + zi * zi
        inv = jax.lax.rsqrt(jnp.maximum(s2, TINY))          # ~ 1/|z|
        mod = s2 * inv                                      # ~ |z|
        new_mod = jnp.maximum(mod + b_mod_ref[...], 0.0)
        scale = new_mod * inv
        pos = s2 > 0.0
        r_out = jnp.where(pos, zr * scale, new_mod)         # atan2(0,0)=0 -> cos=1
        i_out = jnp.where(pos, zi * scale, 0.0)             #                sin=0
        h = jnp.concatenate([r_out, i_out], axis=-1)        # (B, 2H) == conv channel order

        # ---- hidden layer 0: grouped 1x1 conv as ONE block-diag matmul + BN + LeakyReLU ----
        h = _dot(h, w_h0_ref)
        h = _bn_train(h)
        h = jnp.where(h >= 0.0, h, LEAKY_SLOPE * h)

        # ---- remaining grouped hidden layers ----
        for w_ref in rest_hidden:
            h = _dot(h, w_ref)
            h = _bn_train(h)
            h = jnp.where(h >= 0.0, h, LEAKY_SLOPE * h)

        # ---- output 1x1 conv (groups=1; bias kept: no BN follows). squeeze() is a no-op.
        out = _dot(h, w_out_ref) + b_out_ref[...]
        o_ref[...] = out.astype(o_ref.dtype)

    return kernel


def _grouped_conv_to_blockdiag(conv_w, groups):
    """Conv1d(k=1, groups=G) weight (Cout, Cin/G, 1) -> block-diagonal (Cin, Cout) matrix."""
    c_out, gin, _ = conv_w.shape
    gout = c_out // groups
    c_in = gin * groups
    w = jnp.zeros((c_in, c_out), conv_w.dtype)
    for g in range(groups):
        block = conv_w[g * gout:(g + 1) * gout, :, 0].T      # (gin, gout)
        w = w.at[g * gin:(g + 1) * gin, g * gout:(g + 1) * gout].set(block)
    return w


def pack_params(w_real, w_imag, b_mod, hidden_conv_ws, out_conv_w, out_conv_b, num_chan,
                matmul_dtype=jnp.float32):
    """One-time packing of PyTorch-convention parameters into MXU-friendly kernel inputs.

    Pre-BN linear/conv biases are intentionally NOT packed: with a fresh module in TRAINING
    mode (BatchNorm gamma=1, beta=0, batch stats) they are exactly cancelled by the mean
    subtraction.  matmul_dtype=jnp.bfloat16 gives MXU-native single-pass matmuls on v6e/v7x
    (f32 accumulation is kept in-kernel)."""
    assert len(hidden_conv_ws) >= 1, "this kernel expects len(hidden_dims) >= 2"
    # Fused input weight: [real | imag] @ w_in -> [zr | zi]   shape (2*in_dim, 2H)
    w_in = jnp.concatenate(
        [jnp.concatenate([w_real.T, -w_imag.T], axis=0),     # -> real part columns
         jnp.concatenate([w_imag.T,  w_real.T], axis=0)],    # -> imag part columns
        axis=1).astype(matmul_dtype)
    bd = [_grouped_conv_to_blockdiag(w, num_chan).astype(matmul_dtype) for w in hidden_conv_ws]
    w_out = out_conv_w[:, :, 0].T.astype(matmul_dtype)       # (C_last, 2*outdim)
    return dict(w_in=w_in,
                b_mod=b_mod.reshape(1, -1).astype(jnp.float32),
                w_h0=bd[0],                                  # full (2H, C) block-diagonal
                hidden_rest=list(bd[1:]),
                w_out=w_out,
                b_out=out_conv_b.reshape(1, -1).astype(jnp.float32),
                matmul_dtype=matmul_dtype)


def channeled_forward(x, packed):
    B = x.shape[0]
    two_outdim = packed["w_out"].shape[1]
    num_hidden = 1 + len(packed["hidden_rest"])
    inputs = [x, packed["w_in"], packed["b_mod"], packed["w_h0"],
              *packed["hidden_rest"], packed["w_out"], packed["b_out"]]

    # ---- advisory cost estimate (matmul MACs x2, rough transcendental count, HBM bytes) ----
    K0, H2 = packed["w_in"].shape
    C0 = packed["w_h0"].shape[1]
    C_last = packed["w_out"].shape[0]
    flops = 2 * B * K0 * H2 + 2 * B * packed["w_h0"].shape[0] * C0
    for w in packed["hidden_rest"]:
        flops += 2 * B * w.shape[0] * w.shape[1]
    flops += 2 * B * C_last * two_outdim
    transcendentals = B * (H2 // 2) + H2 + num_hidden * C0     # rsqrt pushes (mod_relu + BNs)
    bytes_accessed = sum(int(a.size) * a.dtype.itemsize for a in inputs) + B * two_outdim * 4

    # All blocks are full-array (toy shapes): the (8,128) divisibility rule does not apply.
    # TODO(synk): at larger outdim/width, pad the output feature axis to a multiple of 128
    # lanes (slice in the wrapper) so stores are unmasked vst and weight tiles are lane-dense.
    in_specs = [pl.BlockSpec(a.shape, lambda i: (0, 0)) for a in inputs]

    return pl.pallas_call(
        _make_kernel(num_hidden, packed["matmul_dtype"]),
        out_shape=jax.ShapeDtypeStruct((B, two_outdim), jnp.float32),
        grid=(1,),
        in_specs=in_specs,
        out_specs=pl.BlockSpec((B, two_outdim), lambda i: (0, 0)),
        compiler_params=pltpu.CompilerParams(dimension_semantics=("arbitrary",)),
        cost_estimate=pl.CostEstimate(flops=int(flops),
                                      transcendentals=int(transcendentals),
                                      bytes_accessed=int(bytes_accessed)),
    )(*inputs)


if __name__ == "__main__":
    # channeled_lin_layers_avg(in_dim=16, hidden_dims=[8, 8], num_chan=4, outdim=8, dropout=0)
    in_dim = 16            # complex input dim -> x has 2*in_dim = 32 real features
    hidden_dims = [8, 8]   # width = 8 -> one grouped hidden layer
    num_chan = 4
    outdim = 8
    B = 8

    H = num_chan * hidden_dims[0]   # 32 features per real/imag half after the input layer
    C = 2 * H                       # 64 channels entering the hidden / output 1x1 convs
    gin = C // num_chan             # per-group input channels of the grouped conv
    gout = C // num_chan

    key = jax.random.PRNGKey(0)
    ks = jax.random.split(key, 10)

    def u(k, shape, fan_in):
        b = 1.0 / math.sqrt(fan_in)
        return jax.random.uniform(k, shape, minval=-b, maxval=b, dtype=jnp.float32)

    x = jax.random.normal(ks[0], (B, 2 * in_dim), dtype=jnp.float32)

    # input complex linear layer: nn.Linear(in_dim, H) x2 (biases only used by the reference)
    w_real, b_real = u(ks[1], (H, in_dim), in_dim), u(ks[2], (H,), in_dim)
    w_imag, b_imag = u(ks[3], (H, in_dim), in_dim), u(ks[4], (H,), in_dim)
    # mod_relu bias: 2*(rand - 0.5)/sqrt(H)
    b_mod = 2.0 * (jax.random.uniform(ks[5], (H,), dtype=jnp.float32) - 0.5) / math.sqrt(H)

    # hidden layer: Conv1d(C, C, k=1, groups=num_chan) (+ bias, reference only), BN, LeakyReLU
    conv_h_w, conv_h_b = u(ks[6], (C, gin, 1), gin), u(ks[7], (C,), gin)

    # output layer: Conv1d(C, 2*outdim, k=1, groups=1) with bias (kept in the kernel)
    conv_o_w, conv_o_b = u(ks[8], (2 * outdim, C, 1), C), u(ks[9], (2 * outdim,), C)

    # ---------------- pure-JAX reference of the PyTorch forward (all biases kept) ------------
    mm = lambda a, b: jnp.dot(a, b, precision="highest")

    def bn_ref(z):
        mu = z.mean(0, keepdims=True)
        var = ((z - mu) ** 2).mean(0, keepdims=True)
        return (z - mu) / jnp.sqrt(var + BN_EPS)

    real, imag = x[:, :in_dim], x[:, in_dim:]
    rz = bn_ref((mm(real, w_real.T) + b_real) - (mm(imag, w_imag.T) + b_imag))
    iz = bn_ref((mm(real, w_imag.T) + b_imag) + (mm(imag, w_real.T) + b_real))
    modulus = jnp.sqrt(rz ** 2 + iz ** 2)
    theta = jnp.arctan2(iz, rz)
    modulus = jnp.maximum(jnp.abs(modulus) + b_mod, 0.0)      # mod_relu
    h = jnp.concatenate([modulus * jnp.cos(theta), modulus * jnp.sin(theta)], axis=-1)

    cols = []
    for g in range(num_chan):                                 # grouped 1x1 conv
        hg = h[:, g * gin:(g + 1) * gin]
        wg = conv_h_w[g * gout:(g + 1) * gout, :, 0]
        cols.append(mm(hg, wg.T) + conv_h_b[g * gout:(g + 1) * gout])
    h = jnp.concatenate(cols, axis=-1)
    h = bn_ref(h)
    h = jnp.where(h >= 0.0, h, LEAKY_SLOPE * h)

    ref = mm(h, conv_o_w[:, :, 0].T) + conv_o_b               # output conv (+ squeeze no-op)

    # ---------------- fused Pallas kernel: f32 MXU-input path (tight check) -------------------
    packed = pack_params(w_real, w_imag, b_mod, [conv_h_w], conv_o_w, conv_o_b, num_chan,
                         matmul_dtype=jnp.float32)
    out = channeled_forward(x, packed)
    jax.block_until_ready(out)
    assert out.shape == ref.shape == (B, 2 * outdim)
    err = float(jnp.max(jnp.abs(out - ref)))
    assert jnp.allclose(out, ref, atol=1e-3, rtol=1e-3), f"f32 path max abs err {err}"

    # ---------------- bf16 MXU-input path (v6e/v7x native; f32 accumulation) ------------------
    # Loose sanity bound only: bf16 operand rounding is the expected source of difference.
    packed_bf16 = pack_params(w_real, w_imag, b_mod, [conv_h_w], conv_o_w, conv_o_b, num_chan,
                              matmul_dtype=jnp.bfloat16)
    out_bf16 = channeled_forward(x, packed_bf16)
    jax.block_until_ready(out_bf16)
    err_bf16 = float(jnp.max(jnp.abs(out_bf16 - ref)))
    assert jnp.allclose(out_bf16, ref, atol=1e-1, rtol=1e-1), f"bf16 path max abs err {err_bf16}"

    print("KERNEL_OK")
</pallas_src>

<mosaic_0001>
module attributes {stable_mosaic.version = 11 : i64} {
  func.func @kernel(%arg0: i32, %arg1: memref<8x32xf32, #tpu.memory_space<vmem>>, %arg2: memref<32x64xf32, #tpu.memory_space<vmem>>, %arg3: memref<1x32xf32, #tpu.memory_space<vmem>>, %arg4: memref<64x64xf32, #tpu.memory_space<vmem>>, %arg5: memref<64x16xf32, #tpu.memory_space<vmem>>, %arg6: memref<1x16xf32, #tpu.memory_space<vmem>>, %arg7: memref<8x16xf32, #tpu.memory_space<vmem>>) attributes {dimension_semantics = [#tpu.dimension_semantics<arbitrary>], iteration_bounds = array<i64: 1>, scalar_prefetch = 0 : i64, scratch_operands = 0 : i64, tpu.core_type = #tpu.core_type<tc>, window_params = [{pipeline_mode = #tpu.pipeline_mode<synchronous>, transform_indices = @transform_0, window_bounds = array<i64: 8, 32>}, {pipeline_mode = #tpu.pipeline_mode<synchronous>, transform_indices = @transform_1, window_bounds = array<i64: 32, 64>}, {pipeline_mode = #tpu.pipeline_mode<synchronous>, transform_indices = @transform_2, window_bounds = array<i64: 1, 32>}, {pipeline_mode = #tpu.pipeline_mode<synchronous>, transform_indices = @transform_3, window_bounds = array<i64: 64, 64>}, {pipeline_mode = #tpu.pipeline_mode<synchronous>, transform_indices = @transform_4, window_bounds = array<i64: 64, 16>}, {pipeline_mode = #tpu.pipeline_mode<synchronous>, transform_indices = @transform_5, window_bounds = array<i64: 1, 16>}, {pipeline_mode = #tpu.pipeline_mode<synchronous>, transform_indices = @transform_6, window_bounds = array<i64: 8, 16>}]} {
    %c0 = arith.constant 0 : index
    %c0_0 = arith.constant 0 : index
    %0 = vector.load %arg1[%c0, %c0_0] : memref<8x32xf32, #tpu.memory_space<vmem>>, vector<8x32xf32>
    %c0_1 = arith.constant 0 : index
    %c0_2 = arith.constant 0 : index
    %1 = vector.load %arg2[%c0_1, %c0_2] : memref<32x64xf32, #tpu.memory_space<vmem>>, vector<32x64xf32>
    %cst = arith.constant dense<0.000000e+00> : vector<8x64xf32>
    %2 = tpu.matmul %0, %1, %cst {dimension_numbers = #tpu.dot_dimension_numbers<[1], [0], [0], [1], [0, 0, 1, 1], [], []>} : vector<8x32xf32>, vector<32x64xf32>, vector<8x64xf32> -> vector<8x64xf32>
    %3 = arith.mulf %2, %2 : vector<8x64xf32>
    %4 = tpu.concatenate %2, %3 in 1 : vector<8x64xf32>, vector<8x64xf32> -> vector<8x128xf32>
    %cst_3 = arith.constant dense<0.000000e+00> : vector<128xf32>
    %5 = vector.multi_reduction <add>, %4, %cst_3 [0] : vector<8x128xf32> to vector<128xf32>
    %6 = vector.shape_cast %5 : vector<128xf32> to vector<1x128xf32>
    %cst_4 = arith.constant 8.000000e+00 : f32
    %7 = vector.broadcast %cst_4 : f32 to vector<1x128xf32>
    %8 = arith.divf %6, %7 : vector<1x128xf32>
    %9 = vector.extract_strided_slice %8 {offsets = [0, 0], sizes = [1, 64], strides = [1, 1]} : vector<1x128xf32> to vector<1x64xf32>
    %10 = vector.extract_strided_slice %8 {offsets = [0, 64], sizes = [1, 64], strides = [1, 1]} : vector<1x128xf32> to vector<1x64xf32>
    %11 = arith.mulf %9, %9 : vector<1x64xf32>
    %12 = arith.subf %10, %11 : vector<1x64xf32>
    %cst_5 = arith.constant 0.000000e+00 : f32
    %13 = vector.broadcast %cst_5 : f32 to vector<1x64xf32>
    %14 = arith.maximumf %12, %13 : vector<1x64xf32>
    %15 = vector.broadcast %9 : vector<1x64xf32> to vector<8x64xf32>
    %16 = arith.subf %2, %15 : vector<8x64xf32>
    %cst_6 = arith.constant 9.99999974E-6 : f32
    %17 = vector.broadcast %cst_6 : f32 to vector<1x64xf32>
    %18 = arith.addf %14, %17 : vector<1x64xf32>
    %19 = math.rsqrt %18 : vector<1x64xf32>
    %20 = vector.broadcast %19 : vector<1x64xf32> to vector<8x64xf32>
    %21 = arith.mulf %16, %20 : vector<8x64xf32>
    %22 = vector.extract_strided_slice %21 {offsets = [0, 0], sizes = [8, 32], strides = [1, 1]} : vector<8x64xf32> to vector<8x32xf32>
    %23 = vector.extract_strided_slice %21 {offsets = [0, 32], sizes = [8, 32], strides = [1, 1]} : vector<8x64xf32> to vector<8x32xf32>
    %24 = arith.mulf %22, %22 : vector<8x32xf32>
    %25 = arith.mulf %23, %23 : vector<8x32xf32>
    %26 = arith.addf %24, %25 : vector<8x32xf32>
    %cst_7 = arith.constant 1.000000e-30 : f32
    %27 = vector.broadcast %cst_7 : f32 to vector<8x32xf32>
    %28 = arith.maximumf %26, %27 : vector<8x32xf32>
    %29 = math.rsqrt %28 : vector<8x32xf32>
    %30 = arith.mulf %26, %29 : vector<8x32xf32>
    %c0_8 = arith.constant 0 : index
    %c0_9 = arith.constant 0 : index
    %31 = vector.load %arg3[%c0_8, %c0_9] : memref<1x32xf32, #tpu.memory_space<vmem>>, vector<1x32xf32>
    %32 = vector.broadcast %31 : vector<1x32xf32> to vector<8x32xf32>
    %33 = arith.addf %30, %32 : vector<8x32xf32>
    %cst_10 = arith.constant 0.000000e+00 : f32
    %34 = vector.broadcast %cst_10 : f32 to vector<8x32xf32>
    %35 = arith.maximumf %33, %34 : vector<8x32xf32>
    %36 = arith.mulf %35, %29 : vector<8x32xf32>
    %cst_11 = arith.constant 0.000000e+00 : f32
    %37 = vector.broadcast %cst_11 : f32 to vector<8x32xf32>
    %38 = arith.cmpf ogt, %26, %37 : vector<8x32xf32>
    %39 = arith.mulf %22, %36 : vector<8x32xf32>
    %40 = arith.select %38, %39, %35 : vector<8x32xi1>, vector<8x32xf32>
    %41 = arith.mulf %23, %36 : vector<8x32xf32>
    %cst_12 = arith.constant 0.000000e+00 : f32
    %42 = vector.broadcast %cst_12 : f32 to vector<8x32xf32>
    %43 = arith.select %38, %41, %42 : vector<8x32xi1>, vector<8x32xf32>
    %44 = tpu.concatenate %40, %43 in 1 : vector<8x32xf32>, vector<8x32xf32> -> vector<8x64xf32>
    %c0_13 = arith.constant 0 : index
    %c0_14 = arith.constant 0 : index
    %45 = vector.load %arg4[%c0_13, %c0_14] : memref<64x64xf32, #tpu.memory_space<vmem>>, vector<64x64xf32>
    %cst_15 = arith.constant dense<0.000000e+00> : vector<8x64xf32>
    %46 = tpu.matmul %44, %45, %cst_15 {dimension_numbers = #tpu.dot_dimension_numbers<[1], [0], [0], [1], [0, 0, 1, 1], [], []>} : vector<8x64xf32>, vector<64x64xf32>, vector<8x64xf32> -> vector<8x64xf32>
    %47 = arith.mulf %46, %46 : vector<8x64xf32>
    %48 = tpu.concatenate %46, %47 in 1 : vector<8x64xf32>, vector<8x64xf32> -> vector<8x128xf32>
    %cst_16 = arith.constant dense<0.000000e+00> : vector<128xf32>
    %49 = vector.multi_reduction <add>, %48, %cst_16 [0] : vector<8x128xf32> to vector<128xf32>
    %50 = vector.shape_cast %49 : vector<128xf32> to vector<1x128xf32>
    %cst_17 = arith.constant 8.000000e+00 : f32
    %51 = vector.broadcast %cst_17 : f32 to vector<1x128xf32>
    %52 = arith.divf %50, %51 : vector<1x128xf32>
    %53 = vector.extract_strided_slice %52 {offsets = [0, 0], sizes = [1, 64], strides = [1, 1]} : vector<1x128xf32> to vector<1x64xf32>
    %54 = vector.extract_strided_slice %52 {offsets = [0, 64], sizes = [1, 64], strides = [1, 1]} : vector<1x128xf32> to vector<1x64xf32>
    %55 = arith.mulf %53, %53 : vector<1x64xf32>
    %56 = arith.subf %54, %55 : vector<1x64xf32>
    %cst_18 = arith.constant 0.000000e+00 : f32
    %57 = vector.broadcast %cst_18 : f32 to vector<1x64xf32>
    %58 = arith.maximumf %56, %57 : vector<1x64xf32>
    %59 = vector.broadcast %53 : vector<1x64xf32> to vector<8x64xf32>
    %60 = arith.subf %46, %59 : vector<8x64xf32>
    %cst_19 = arith.constant 9.99999974E-6 : f32
    %61 = vector.broadcast %cst_19 : f32 to vector<1x64xf32>
    %62 = arith.addf %58, %61 : vector<1x64xf32>
    %63 = math.rsqrt %62 : vector<1x64xf32>
    %64 = vector.broadcast %63 : vector<1x64xf32> to vector<8x64xf32>
    %65 = arith.mulf %60, %64 : vector<8x64xf32>
    %cst_20 = arith.constant 0.000000e+00 : f32
    %66 = vector.broadcast %cst_20 : f32 to vector<8x64xf32>
    %67 = arith.cmpf oge, %65, %66 : vector<8x64xf32>
    %cst_21 = arith.constant 0.00999999977 : f32
    %68 = vector.broadcast %cst_21 : f32 to vector<8x64xf32>
    %69 = arith.mulf %68, %65 : vector<8x64xf32>
    %70 = arith.select %67, %65, %69 : vector<8x64xi1>, vector<8x64xf32>
    %c0_22 = arith.constant 0 : index
    %c0_23 = arith.constant 0 : index
    %71 = vector.load %arg5[%c0_22, %c0_23] : memref<64x16xf32, #tpu.memory_space<vmem>>, vector<64x16xf32>
    %cst_24 = arith.constant dense<0.000000e+00> : vector<8x16xf32>
    %72 = tpu.matmul %70, %71, %cst_24 {dimension_numbers = #tpu.dot_dimension_numbers<[1], [0], [0], [1], [0, 0, 1, 1], [], []>} : vector<8x64xf32>, vector<64x16xf32>, vector<8x16xf32> -> vector<8x16xf32>
    %c0_25 = arith.constant 0 : index
    %c0_26 = arith.constant 0 : index
    %73 = vector.load %arg6[%c0_25, %c0_26] : memref<1x16xf32, #tpu.memory_space<vmem>>, vector<1x16xf32>
    %74 = vector.broadcast %73 : vector<1x16xf32> to vector<8x16xf32>
    %75 = arith.addf %72, %74 : vector<8x16xf32>
    %c0_27 = arith.constant 0 : index
    %c0_28 = arith.constant 0 : index
    %76 = vector.load %arg7[%c0_27, %c0_28] : memref<8x16xf32, #tpu.memory_space<vmem>>, vector<8x16xf32>
    tpu.vector_store %arg7[%c0_27, %c0_28], %75 {strides = array<i32>} : memref<8x16xf32, #tpu.memory_space<vmem>>, vector<8x16xf32>,
    return
  }
  func.func @transform_0(%arg0: i32) -> (i32, i32) {
    %c0_i32 = arith.constant 0 : i32
    %c0_i32_0 = arith.constant 0 : i32
    %c0_i32_1 = arith.constant 0 : i32
    return %c0_i32, %c0_i32_0 : i32, i32
  }
  func.func @transform_1(%arg0: i32) -> (i32, i32) {
    %c0_i32 = arith.constant 0 : i32
    %c0_i32_0 = arith.constant 0 : i32
    %c0_i32_1 = arith.constant 0 : i32
    return %c0_i32, %c0_i32_0 : i32, i32
  }
  func.func @transform_2(%arg0: i32) -> (i32, i32) {
    %c0_i32 = arith.constant 0 : i32
    %c0_i32_0 = arith.constant 0 : i32
    %c0_i32_1 = arith.constant 0 : i32
    return %c0_i32, %c0_i32_0 : i32, i32
  }
  func.func @transform_3(%arg0: i32) -> (i32, i32) {
    %c0_i32 = arith.constant 0 : i32
    %c0_i32_0 = arith.constant 0 : i32
    %c0_i32_1 = arith.constant 0 : i32
    return %c0_i32, %c0_i32_0 : i32, i32
  }
  func.func @transform_4(%arg0: i32) -> (i32, i32) {
    %c0_i32 = arith.constant 0 : i32
    %c0_i32_0 = arith.constant 0 : i32
    %c0_i32_1 = arith.constant 0 : i32
    return %c0_i32, %c0_i32_0 : i32, i32
  }
  func.func @transform_5(%arg0: i32) -> (i32, i32) {
    %c0_i32 = arith.constant 0 : i32
    %c0_i32_0 = arith.constant 0 : i32
    %c0_i32_1 = arith.constant 0 : i32
    return %c0_i32, %c0_i32_0 : i32, i32
  }
  func.func @transform_6(%arg0: i32) -> (i32, i32) {
    %c0_i32 = arith.constant 0 : i32
    %c0_i32_0 = arith.constant 0 : i32
    %c0_i32_1 = arith.constant 0 : i32
    return %c0_i32, %c0_i32_0 : i32, i32
  }
}

</mosaic_0001>

<bundles_post_ra>
// kernel: tpu_custom_call.1
= control target key start
LH: loop header
LB: loop body
LE: loop exit
PB: predicated region body
PF: predicated region fallthrough
CT: control target
= control target key end

     0   :  { %11 = vsyncpa [#allocation3], 0  ;;  %s742_s0 = inlined_call_operand.vmem [shape: f32[8,32], index: 0, kind: input, shape index: {}]   ;;  %s743_s1 = inlined_call_operand.hbm [shape: f32[32,64], index: 1, kind: input, shape index: {}]   ;;  %s744_s2 = inlined_call_operand.vmem [shape: f32[1,32], index: 2, kind: input, shape index: {}]   ;;  %s745_s3 = inlined_call_operand.vmem [shape: f32[64,64], index: 3, kind: input, shape index: {}]   ;;  %s746_s4 = inlined_call_operand.vmem [shape: f32[64,16], index: 4, kind: input, shape index: {}]   ;;  %s747_s5 = inlined_call_operand.vmem [shape: f32[1,16], index: 5, kind: input, shape index: {}]   ;;  %s748_s6 = inlined_call_operand.hbm [shape: f32[8,16], index: 6, kind: output, shape index: {}]  }
   0x1   :  { %12 = vsyncpa [#allocation4], 0  ;;  %s580_s21 = smov [#allocation2]   ;;  %s532_s25 = scalar_lea.hbm %s743_s1, 512 }
   0x2   :  { %s20_s22 = sshll.u32 %s580_s21, 4  ;;  %p533_p0 = scmp.ne.s32.totalorder %s743_s1, %s532_s25  ;;  %s21_s22 = int_to_ptr.vmem [resolvable:$true] %s20_s22 }
   0x3   :  { %p536_p1 = scmp.lt.u32.totalorder %s532_s25, %s743_s1 }
   0x5   :  { %p538_p2 = pnand %p536_p1, %p533_p0 }
   0x7   :  { %541 = shalt.err (!%p538_p2)
}
   0x8   :  { %s542_s30 = scalar_lea.vmem %s21_s22, 512  ;;  %p547_p4 = scmp.lt.s32.totalorder %s21_s22, %s21_s22 }
   0x9   :  { %p543_p3 = scmp.ne.s32.totalorder %s21_s22, %s542_s30  ;;  %p548_p5 = scmp.lt.s32.totalorder %s542_s30, %s542_s30 }
   0xb   :  { %p549_p6 = por %p548_p5, %p547_p4 }
   0xd   :  { %p550_p7 = pnand %p549_p6, %p543_p3 }
   0xf   :  { %553 = shalt.err (!%p550_p7)
}
  0x10   :  { %s581_s7 = smov 128   ;;  %s582_s8 = smov 8  }
  0x11   :  { %26 = dma.hbm_to_vmem [thread:$0]  %s743_s1, 512, %s21_s22, [#allocation3], %s581_s7, %s581_s7, %s582_s8  }
  0x12   :  { %576 = dma.done.wait [#allocation3], 512  }
  0x13   :  { %577 = vsyncadd [#allocation3], 4294966784  ;;  %v583_v0 = vmov 0.0|0.0   ;;  %vm584_vm0 = vmmov 0   ;;  %v585_v1 = vmov 0.0   ;;  %v39_v2 = vld [vmem:[#allocation2] sm:$0xff]  ;;  %v142_v26 = vlaneseq }
  0x14   :  { %486 = vmatprep.subr.bf16.mxu0 %v583_v0  ;;  %445 = vmatprep.mubr.msk.f32.mxu0 %vm584_vm0, %v585_v1  ;;  %v40_v3 = vld [vmem:[#allocation2 + $0x8] sm:$0xff]  ;;  %v41_v4 = vld [vmem:[#allocation2 + $0x10] sm:$0xff]  ;;  %v42_v6 = vld [vmem:[#allocation2 + $0x18] sm:$0xff]  ;;  %vm43_vm1 = vcmask 261120   ;;  %s586_s12 = smov 64   ;;  %vm122_vm2 = vcmask 523264  }
  0x15   :  { %492 = vmatprep.subr.bf16.mxu1 %v583_v0  ;;  %464 = vmatprep.mubr.msk.f32.mxu1 %vm584_vm0, %v585_v1  ;;  %v487_v5 = vpack.c.bf16 %v40_v3, %v39_v2  ;;  %v490_v7 = vpack.c.bf16 %v42_v6, %v41_v4  ;;  %v38_v8 = vld [vmem:[%s742_s0] sm:$0xff]  ;;  %v651_v27 = vshrl.u32 %v142_v26, 7  ;;  %s587_s0 = smov 96   ;;  %s588_s15 = smov 32   ;;  %v189_v47 = vld [vmem:[%s745_s3 + $0x8] sm:$0xff]  ;;  %v190_v48 = vld [vmem:[%s745_s3 + $0x10] sm:$0xff] }
  0x16   :  { %v410_v39 = vld [vmem:[%s744_s2] ss:$0 sm:$0xff]  ;;  %v191_v50 = vld [vmem:[%s745_s3 + $0x18] sm:$0xff]  ;;  %v193_v53 = vld [vmem:[%s745_s3 + $0x28] sm:$0xff]  ;;  %vm392_vm5 = vcmask 130048  }
  0x17   :  { %488 = vmatpush3.bf16.msra.mxu0 %v487_v5  ;;  %v144_v28 = vsub.s32 0, %v651_v27  ;;  %v188_v46 = vld [vmem:[%s745_s3] sm:$0xff]  ;;  %v496_v51 = vpack.c.bf16 %v191_v50, %v190_v48  ;;  %v194_v55 = vld [vmem:[%s745_s3 + $0x30] sm:$0xff]  ;;  %v195_v56 = vld [vmem:[%s745_s3 + $0x38] sm:$0xff] }
  0x18   :  { %489 = vmatprep.subr.bf16.mxu0 %v583_v0  ;;  %v493_v49 = vpack.c.bf16 %v189_v47, %v188_v46  ;;  %v192_v52 = vld [vmem:[%s745_s3 + $0x20] sm:$0xff]  ;;  %v502_v59 = vpack.c.bf16 %v195_v56, %v194_v55 }
  0x19   :  { %v499_v54 = vpack.c.bf16 %v193_v53, %v192_v52 }
  0x1a   :  { %494 = vmatpush3.bf16.msra.mxu1 %v493_v49 }
  0x1b   :  { %491 = vmatpush3.bf16.msra.mxu0 %v490_v7  ;;  %495 = vmatprep.subr.bf16.mxu1 %v583_v0 }
  0x1c   :  { %504 = vmatprep.subr.bf16.mxu0 %v583_v0 }
  0x1e   :  { %446 = vmatmul.mubr.msk.f32.vlgmr.msra.gmra.mrb[0].mxu0 %vm43_vm1, %v38_v8  ;;  %497 = vmatpush3.bf16.msra.mxu1 %v496_v51 }
  0x1f   :  { %483 = vmatprep.mubr.msk.f32.mxu0 %vm584_vm0, %v585_v1  ;;  %498 = vmatprep.subr.bf16.mxu1 %v583_v0 }
  0x22   :  { %500 = vmatpush3.bf16.msra.mxu1 %v499_v54 }
  0x23   :  { %501 = vmatprep.subr.bf16.mxu1 %v583_v0 }
  0x26   :  { %503 = vmatpush3.bf16.msra.mxu1 %v502_v59 }
  0xf1   :  { %v113_v9 = vpop.f32.mrb[0].mxu0 }
  0xf2   :  { %v447_v10 = vpop.f32.mrb[1].mxu0  ;;  %v117_v11 = vmul.f32 %v113_v9, %v113_v9 }
  0xf4   :  { %119 = vrot.lane.b32.xlu0 %v117_v11, %s586_s12 }
 0x166   :  { %v120_v12 = vpop.permute.xlu0 %119 }
 0x167   :  { %v123_v13 = vsel %vm122_vm2, %v113_v9, %v120_v12 }
 0x168   :  { %v124_v14 = vrot.slane %v123_v13, 4 }
 0x16a   :  { %v125_v15 = vadd.f32 %v124_v14, %v123_v13  ;;  %v304_v14 = vld [vmem:[%s746_s4] sm:$0xff] }
 0x16c   :  { %v126_v16 = vrot.slane %v125_v15, 2 }
 0x16e   :  { %v127_v17 = vadd.f32 %v126_v16, %v125_v15  ;;  %v305_v15 = vld [vmem:[%s746_s4 + $0x8] sm:$0xff]  ;;  %v306_v16 = vld [vmem:[%s746_s4 + $0x10] sm:$0xff] }
 0x170   :  { %v128_v18 = vrot.slane %v127_v17, 1 }
 0x172   :  { %v129_v19 = vadd.f32 %v128_v18, %v127_v17  ;;  %v505_v17 = vpack.c.bf16 %v305_v15, %v304_v14  ;;  %v307_v18 = vld [vmem:[%s746_s4 + $0x18] sm:$0xff] }
 0x174   :  { %v131_v20 = vmul.f32 0.125, %v129_v19  ;;  %506 = vmatpush3.bf16.msra.mxu0 %v505_v17  ;;  %v508_v19 = vpack.c.bf16 %v307_v18, %v306_v16 }
 0x175   :  { %507 = vmatprep.subr.bf16.mxu0 %v583_v0 }
 0x176   :  { %v132_v21 = vmul.f32 %v131_v20, %v131_v20  ;;  %v139_v31 = vsub.f32 %v113_v9, %v131_v20 }
 0x178   :  { %134 = vrot.lane.b32.xlu0 %v132_v21, %s586_s12  ;;  %v309_v21 = vld [vmem:[%s746_s4 + $0x28] sm:$0xff]  ;;  %509 = vmatpush3.bf16.msra.mxu0 %v508_v19 }
 0x179   :  { %510 = vmatprep.subr.bf16.mxu0 %v583_v0 }
 0x1ea   :  { %v135_v22 = vpop.permute.xlu0 %134 }
 0x1eb   :  { %v137_v23 = vsub.f32 %v131_v20, %v135_v22  ;;  %v308_v20 = vld [vmem:[%s746_s4 + $0x20] sm:$0xff] }
 0x1ec   :  { %v511_v22 = vpack.c.bf16 %v309_v21, %v308_v20 }
 0x1ed   :  { %v138_v24 = vmax.f32 %v137_v23, 0.0 }
 0x1ee   :  { %512 = vmatpush3.bf16.msra.mxu0 %v511_v22 }
 0x1ef   :  { %v140_v25 = vadd.f32 1e-05, %v138_v24  ;;  %513 = vmatprep.subr.bf16.mxu0 %v583_v0 }
 0x1f1   :  { %526 = vrsqrt.f32 %v140_v25 }
 0x1fb   :  { %v527_v29 = vpop.eup %526 }
 0x1fc   :  { %v145_v30 = vrot.slane %v527_v29, %v144_v28  ;;  %v310_v29 = vld [vmem:[%s746_s4 + $0x30] sm:$0xff] }
 0x1fe   :  { %147 = vrot.lane.b32.xlu1 %v145_v30, %s586_s12  ;;  %v311_v30 = vld [vmem:[%s746_s4 + $0x38] sm:$0xff]  ;;  %s589_s4 = smov [#allocation5]  }
 0x1ff   :  { %s400_s22 = sshll.u32 %s589_s4, 4  ;;  %s401_s22 = int_to_ptr.vmem [resolvable:$true] %s400_s22 }
 0x200   :  { %p559_p9 = scmp.lt.s32.totalorder %s401_s22, %s401_s22 }
 0x270   :  { %v148_v32 = vpop.permute.xlu1 %147 }
 0x271   :  { %v150_v33 = vmul.f32 %v148_v32, %v139_v31  ;;  %v514_v31 = vpack.c.bf16 %v311_v30, %v310_v29 }
 0x273   :  { %v151_v34 = vmul.f32 %v150_v33, %v150_v33  ;;  %515 = vmatpush3.bf16.msra.mxu0 %v514_v31 }
 0x275   :  { %153 = vrot.lane.b32.xlu1 %v151_v34, %s587_s0 }
 0x2e7   :  { %v154_v35 = vpop.permute.xlu1 %153 }
 0x2e8   :  { %v156_v36 = vadd.f32 %v154_v35, %v151_v34 }
 0x2ea   :  { %v157_v37 = vmax.f32 %v156_v36, 1e-30  ;;  %vm170_vm3 = vcmp.gt.f32.partialorder %v156_v36, 0.0 }
 0x2ec   :  { %528 = vrsqrt.f32 %v157_v37 }
 0x2f6   :  { %v529_v38 = vpop.eup %528 }
 0x2f7   :  { %v159_v40 = vmul.f32 %v529_v38, %v156_v36 }
 0x2f9   :  { %v167_v41 = vadd.f32 %v410_v39, %v159_v40 }
 0x2fb   :  { %v168_v42 = vmax.f32 %v167_v41, 0.0 }
 0x2fd   :  { %v169_v43 = vmul.f32 %v529_v38, %v168_v42  ;;  %v412_v38 = vld [vmem:[%s747_s5] ss:$0 sm:$0xff] }
 0x2ff   :  { %174 = vrot.lane.b32.xlu0 %v169_v43, %s588_s15  ;;  %v171_v44 = vmul.f32 %v169_v43, %v150_v33 }
 0x301   :  { %v172_v45 = vsel %vm170_vm3, %v171_v44, %v168_v42 }
 0x371   :  { %v175_v57 = vpop.permute.xlu0 %174 }
 0x372   :  { %v177_v58 = vmul.f32 %v175_v57, %v150_v33 }
 0x374   :  { %179 = vrot.lane.b32.xlu1 %v177_v58, %s587_s0 }
 0x3e6   :  { %v180_v60 = vpop.permute.xlu1 %179 }
 0x3e7   :  { %v182_v61 = vsel %vm170_vm3, %v180_v60, 0.0 }
 0x3e8   :  { %184 = vrot.lane.b32.xlu0 %v182_v61, %s588_s15 }
 0x45a   :  { %v185_v62 = vpop.permute.xlu0 %184 }
 0x45b   :  { %v187_v63 = vsel %vm43_vm1, %v172_v45, %v185_v62 }
 0x45c   :  { %465 = vmatmul.mubr.msk.f32.vlgmr.msra.gmra.mrb[0].mxu1 %vm122_vm2, %v187_v63 }
 0x52f   :  { %v265_v1 = vpop.f32.mrb[0].mxu1 }
 0x530   :  { %v269_v2 = vmul.f32 %v265_v1, %v265_v1  ;;  %v466_v3 = vpop.f32.mrb[1].mxu1 }
 0x532   :  { %271 = vrot.lane.b32.xlu1 %v269_v2, %s586_s12 }
 0x5a4   :  { %v272_v4 = vpop.permute.xlu1 %271 }
 0x5a5   :  { %v274_v5 = vsel %vm122_vm2, %v265_v1, %v272_v4 }
 0x5a6   :  { %v275_v6 = vrot.slane %v274_v5, 4 }
 0x5a8   :  { %v276_v7 = vadd.f32 %v275_v6, %v274_v5 }
 0x5aa   :  { %v277_v8 = vrot.slane %v276_v7, 2 }
 0x5ac   :  { %v278_v9 = vadd.f32 %v277_v8, %v276_v7 }
 0x5ae   :  { %v279_v10 = vrot.slane %v278_v9, 1 }
 0x5b0   :  { %v280_v11 = vadd.f32 %v279_v10, %v278_v9 }
 0x5b2   :  { %v281_v12 = vmul.f32 0.125, %v280_v11 }
 0x5b4   :  { %v282_v13 = vmul.f32 %v281_v12, %v281_v12  ;;  %v289_v0 = vsub.f32 %v265_v1, %v281_v12 }
 0x5b6   :  { %284 = vrot.lane.b32.xlu0 %v282_v13, %s586_s12 }
 0x628   :  { %v285_v23 = vpop.permute.xlu0 %284 }
 0x629   :  { %v287_v24 = vsub.f32 %v281_v12, %v285_v23 }
 0x62b   :  { %v288_v25 = vmax.f32 %v287_v24, 0.0 }
 0x62d   :  { %v290_v26 = vadd.f32 1e-05, %v288_v25 }
 0x62f   :  { %530 = vrsqrt.f32 %v290_v26 }
 0x639   :  { %v531_v32 = vpop.eup %530 }
 0x63a   :  { %v295_v33 = vrot.slane %v531_v32, %v144_v28 }
 0x63c   :  { %297 = vrot.lane.b32.xlu1 %v295_v33, %s586_s12  ;;  %s554_s12 = scalar_lea.vmem %s401_s22, 128 }
 0x63d   :  { %p555_p8 = scmp.ne.s32.totalorder %s401_s22, %s554_s12  ;;  %p560_p10 = scmp.lt.s32.totalorder %s554_s12, %s554_s12 }
 0x63f   :  { %p561_p11 = por %p560_p10, %p559_p9 }
 0x641   :  { %p562_p12 = pnand %p561_p11, %p555_p8 }
 0x6ae   :  { %v298_v34 = vpop.permute.xlu1 %297 }
 0x6af   :  { %v300_v35 = vmul.f32 %v298_v34, %v289_v0 }
 0x6b1   :  { %vm301_vm4 = vcmp.ge.f32.partialorder %v300_v35, 0.0  ;;  %v302_v36 = vmul.f32 0.01, %v300_v35 }
 0x6b3   :  { %v303_v37 = vsel %vm301_vm4, %v300_v35, %v302_v36 }
 0x6b4   :  { %484 = vmatmul.mubr.msk.f32.vlgmr.msra.gmra.mrb[2].mxu0 %vm122_vm2, %v303_v37 }
 0x787   :  { %v388_v39 = vpop.f32.mrb[2].mxu0 }
 0x788   :  { %v389_v27 = vadd.f32 %v412_v38, %v388_v39  ;;  %v485_v28 = vpop.f32.mrb[3].mxu0 }
 0x78a   :  { %393 = vst.msk [vmem:[#allocation5] sm:$0xff] %vm392_vm5, %v389_v27 }
 0x78b   :  { %565 = shalt.err (!%p562_p12)
}
 0x78c   :  { %s566_s25 = scalar_lea.hbm %s748_s6, 128 }
 0x78d   :  { %p567_p13 = scmp.ne.s32.totalorder %s748_s6, %s566_s25  ;;  %p570_p0 = scmp.lt.u32.totalorder %s566_s25, %s748_s6 }
 0x78f   :  { %p572_p1 = pnand %p570_p0, %p567_p13 }
 0x791   :  { %575 = shalt.err (!%p572_p1)
}
 0x792   :  { %403 = dma.vmem_to_hbm [thread:$0]  %s401_s22, 128, %s748_s6, [#allocation4]  }
 0x793   :  { %578 = dma.done.wait [#allocation4], 128  }
 0x794   :  { %579 = vsyncadd [#allocation4], 4294967168 }
 0x795   :  { %407 = vsyncpa [#allocation3], 1 }
 0x796   :  { %408 = vsyncpa [#allocation4], 1 }

</bundles_post_ra>
